<compile_context>
chip_gen: v7x
topology: tpu7x:2x2x1
jax: 0.10.0
libtpu: 0.0.40
codegen_flags: <defaults>
</compile_context>

<pallas_src>
import jax
import jax.numpy as jnp
from jax.experimental import pallas as pl
from jax.experimental.pallas import tpu as pltpu

_WIDE_LANE_CANDIDATES = (2048, 1024, 512, 256, 128)  # widest lane-dense last dim
_TARGET_TILE_BYTES = 4 << 20    # ~4 MiB per buffer (in+out, double-buffered = 16 MiB)
_SMALL_LIMIT_BYTES = 4 << 20    # at or below this, skip the grid entirely
_VMEM_LIMIT_BYTES = 32 << 20    # fits v5e/v6e (128 MiB phys) and v7x (64 MiB phys)


# ---------------------------------------------------------------------------
# Primary path: true no-op (alias only, no data movement).
# ---------------------------------------------------------------------------
def _touch_kernel(x_ref, o_ref):
    # Output buffer aliases the input buffer, so the values are already in
    # place.  No loads, no stores, no DMA: just mark the output ref as used.
    del x_ref
    pltpu.touch(o_ref)


def _noop_identity(x: jax.Array) -> jax.Array:
    return pl.pallas_call(
        _touch_kernel,
        out_shape=jax.ShapeDtypeStruct(x.shape, x.dtype),
        in_specs=[pl.BlockSpec(memory_space=pl.ANY)],   # raw HBM ref, no auto-DMA
        out_specs=pl.BlockSpec(memory_space=pl.ANY),
        input_output_aliases={0: 0},
    )(x)


# ---------------------------------------------------------------------------
# Fallback path: explicit (pipelined) copy kernel.
# ---------------------------------------------------------------------------
def _copy_kernel(x_ref, o_ref):
    o_ref[...] = x_ref[...]


def _single_block_copy(x2: jax.Array) -> jax.Array:
    """Whole 2-D view as one VMEM block (small inputs only)."""
    return pl.pallas_call(
        _copy_kernel,
        out_shape=jax.ShapeDtypeStruct(x2.shape, x2.dtype),
        in_specs=[pl.BlockSpec(x2.shape, lambda: (0, 0),
                               memory_space=pltpu.VMEM)],
        out_specs=pl.BlockSpec(x2.shape, lambda: (0, 0),
                               memory_space=pltpu.VMEM),
        input_output_aliases={0: 0},
        compiler_params=pltpu.CompilerParams(
            vmem_limit_bytes=_VMEM_LIMIT_BYTES),
    )(x2)


def _tiled_copy(x2: jax.Array) -> jax.Array:
    """Pipelined tiled copy over the leading axis (~4 MiB per buffer)."""
    rows, cols = x2.shape
    itemsize = x2.dtype.itemsize
    tile_rows = _TARGET_TILE_BYTES // (cols * itemsize)
    tile_rows = max((tile_rows // 8) * 8, 8)        # sublane-aligned block rows
    if tile_rows >= rows:
        return _single_block_copy(x2)
    grid = (pl.cdiv(rows, tile_rows),)
    # Last block dim = full extent (cols), so this is legal even when the
    # last dim is not a multiple of 128 (non-lane-dense fallback shapes).
    return pl.pallas_call(
        _copy_kernel,
        out_shape=jax.ShapeDtypeStruct(x2.shape, x2.dtype),
        grid=grid,
        in_specs=[pl.BlockSpec((tile_rows, cols), lambda i: (i, 0))],
        out_specs=pl.BlockSpec((tile_rows, cols), lambda i: (i, 0)),
        input_output_aliases={0: 0},
        compiler_params=pltpu.CompilerParams(
            dimension_semantics=("parallel",),
            vmem_limit_bytes=_VMEM_LIMIT_BYTES),
    )(x2)


def _identity_copy(x: jax.Array) -> jax.Array:
    """Explicit copy kernel (used only if the no-op path is unavailable)."""
    orig_shape = x.shape
    total = x.size
    if total == 0:
        return x

    # Lane-dense 2-D view with the widest last dim that divides the element
    # count -> fewer, larger unmasked stores and denser DMA rows.
    x2 = None
    for lanes in _WIDE_LANE_CANDIDATES:
        if total % lanes == 0:
            x2 = x.reshape(total // lanes, lanes)
            break
    if x2 is None:
        x2 = x.reshape(-1, orig_shape[-1]) if x.ndim >= 2 else x.reshape(1, total)

    nbytes = total * x.dtype.itemsize
    out2 = _single_block_copy(x2) if nbytes <= _SMALL_LIMIT_BYTES else _tiled_copy(x2)
    return out2.reshape(orig_shape)


# ---------------------------------------------------------------------------
# Public entry point.
# ---------------------------------------------------------------------------
_NOOP_FAILED = False


def identity_neck(x) -> jax.Array:
    """Identity forward pass: returns an array with identical shape/dtype/values.

    Prefer wrapping the caller in `jax.jit(..., donate_argnums=...)` so the
    input buffer is donated and the output alias is honored with zero copies.
    """
    global _NOOP_FAILED
    x = jnp.asarray(x)
    if x.size == 0:
        return x
    if not _NOOP_FAILED:
        try:
            return _noop_identity(x)
        except Exception:            # pragma: no cover - lowering fallback
            _NOOP_FAILED = True
    return _identity_copy(x)


if __name__ == "__main__":
    key = jax.random.PRNGKey(0)
    # NCHW feature map, as the PyTorch conv-style neck would receive.
    x = jax.random.normal(key, (2, 4, 16, 16), dtype=jnp.float32)

    # 1) No-op alias path (eager).
    y = jax.block_until_ready(identity_neck(x))
    assert y.shape == x.shape and y.dtype == x.dtype
    assert bool(jnp.all(y == x)), "identity output mismatch"

    # 2) Same path under jit with input donation: alias honored, zero copies.
    donated_identity = jax.jit(identity_neck, donate_argnums=0)
    xd = x + 0.0                              # private buffer we may donate
    yd = jax.block_until_ready(donated_identity(xd))
    assert bool(jnp.all(yd == x)), "donated identity output mismatch"

    # 3) Explicit copy fallback, small single-block path.
    ys = jax.block_until_ready(_identity_copy(x))
    assert bool(jnp.all(ys == x)), "single-block copy fallback mismatch"

    # 4) Explicit copy fallback, lane-dense tiled path (8 MiB, grid > 1).
    xl = jax.random.normal(key, (8, 64, 64, 64), dtype=jnp.float32)
    yl = jax.block_until_ready(_identity_copy(xl))
    assert yl.shape == xl.shape and yl.dtype == xl.dtype
    assert bool(jnp.all(yl == xl)), "tiled copy fallback mismatch"

    # 5) Explicit copy fallback, non-128-divisible tiled path (ragged block).
    xo = jax.random.normal(key, (1031, 1031), dtype=jnp.float32)
    yo = jax.block_until_ready(_identity_copy(xo))
    assert bool(jnp.all(yo == xo)), "non-lane-dense copy fallback mismatch"

    print("KERNEL_OK")
</pallas_src>

<mosaic_0001>
module attributes {stable_mosaic.version = 11 : i64} {
  func.func @_touch_kernel(%arg0: memref<2x4x16x16xf32, #tpu.memory_space<any>>, %arg1: memref<2x4x16x16xf32, #tpu.memory_space<any>>) attributes {dimension_semantics = [], scalar_prefetch = 0 : i64, scratch_operands = 0 : i64, tpu.core_type = #tpu.core_type<tc>} {
    return
  }
}

module attributes {stable_mosaic.version = 11 : i64} {
  func.func @_copy_kernel(%arg0: memref<1x2048xf32, #tpu.memory_space<vmem>>, %arg1: memref<1x2048xf32, #tpu.memory_space<vmem>>) attributes {dimension_semantics = [], scalar_prefetch = 0 : i64, scratch_operands = 0 : i64, tpu.core_type = #tpu.core_type<tc>} {
    %c0 = arith.constant 0 : index
    %c0_0 = arith.constant 0 : index
    %0 = vector.load %arg0[%c0, %c0_0] : memref<1x2048xf32, #tpu.memory_space<vmem>>, vector<1x2048xf32>
    %c0_1 = arith.constant 0 : index
    %c0_2 = arith.constant 0 : index
    %1 = vector.load %arg1[%c0_1, %c0_2] : memref<1x2048xf32, #tpu.memory_space<vmem>>, vector<1x2048xf32>
    tpu.vector_store %arg1[%c0_1, %c0_2], %0 {strides = array<i32>} : memref<1x2048xf32, #tpu.memory_space<vmem>>, vector<1x2048xf32>,
    return
  }
}

</mosaic_0001>

<bundles_post_ra>
// kernel: tpu_custom_call.1
= control target key start
LH: loop header
LB: loop body
LE: loop exit
PB: predicated region body
PF: predicated region fallthrough
CT: control target
= control target key end

     0   :  { %s16_s0 = inlined_call_operand.hbm [shape: f32[2,4,16,16], index: 0, kind: input, shape index: {}, may-alias: {0,1}]   ;;  %s17_s1 = inlined_call_operand.hbm [shape: f32[2,4,16,16], index: 1, kind: output, shape index: {}, may-alias: {0,1}]  }

// kernel: tpu_custom_call.1
= control target key start
LH: loop header
LB: loop body
LE: loop exit
PB: predicated region body
PF: predicated region fallthrough
CT: control target
= control target key end

     0   :  { %6 = vsyncpa [#allocation3], 0  ;;  %s126_s0 = inlined_call_operand.hbm [shape: f32[1,2048], index: 0, kind: input, shape index: {}, may-alias: {0,1}]   ;;  %s127_s1 = inlined_call_operand.hbm [shape: f32[1,2048], index: 1, kind: output, shape index: {}, may-alias: {0,1}]  }
   0x1   :  { %7 = vsyncpa [#allocation4], 0  ;;  %s90_s6 = smov [#allocation2]   ;;  %s42_s10 = scalar_lea.hbm %s126_s0, 256 }
   0x2   :  { %s14_s7 = sshll.u32 %s90_s6, 4  ;;  %p43_p0 = scmp.ne.s32.totalorder %s126_s0, %s42_s10  ;;  %s15_s7 = int_to_ptr.vmem [resolvable:$true] %s14_s7 }
   0x3   :  { %p46_p1 = scmp.lt.u32.totalorder %s42_s10, %s126_s0 }
   0x5   :  { %p48_p2 = pnand %p46_p1, %p43_p0 }
   0x7   :  { %51 = shalt.err (!%p48_p2)
}
   0x8   :  { %s52_s15 = scalar_lea.vmem %s15_s7, 256  ;;  %p57_p4 = scmp.lt.s32.totalorder %s15_s7, %s15_s7 }
   0x9   :  { %p53_p3 = scmp.ne.s32.totalorder %s15_s7, %s52_s15  ;;  %p58_p5 = scmp.lt.s32.totalorder %s52_s15, %s52_s15 }
   0xb   :  { %p59_p6 = por %p58_p5, %p57_p4 }
   0xd   :  { %p60_p7 = pnand %p59_p6, %p53_p3 }
   0xf   :  { %63 = shalt.err (!%p60_p7)
}
  0x10   :  { %17 = dma.hbm_to_vmem [thread:$0]  %s126_s0, 256, %s15_s7, [#allocation3]  }
  0x11   :  { %86 = dma.done.wait [#allocation3], 256  }
  0x12   :  { %87 = vsyncadd [#allocation3], 4294967040  ;;  %s91_s18 = smov [#allocation5]   ;;  %v21_v0 = vld [vmem:[#allocation2] sm:$0xff]  ;;  %v22_v1 = vld [vmem:[#allocation2 + $0x8] sm:$0xff] }
  0x13   :  { %s31_s19 = sshll.u32 %s91_s18, 4  ;;  %23 = vst [vmem:[#allocation5] sm:$0xff] %v21_v0  ;;  %24 = vst [vmem:[#allocation5 + $0x8] sm:$0xff] %v22_v1  ;;  %s32_s19 = int_to_ptr.vmem [resolvable:$true] %s31_s19 }
  0x14   :  { %s64_s20 = scalar_lea.vmem %s32_s19, 256  ;;  %p69_p9 = scmp.lt.s32.totalorder %s32_s19, %s32_s19 }
  0x15   :  { %p65_p8 = scmp.ne.s32.totalorder %s32_s19, %s64_s20  ;;  %p70_p10 = scmp.lt.s32.totalorder %s64_s20, %s64_s20 }
  0x17   :  { %p71_p11 = por %p70_p10, %p69_p9 }
  0x19   :  { %p72_p12 = pnand %p71_p11, %p65_p8 }
  0x1b   :  { %75 = shalt.err (!%p72_p12)
}
  0x1c   :  { %s76_s0 = scalar_lea.hbm %s127_s1, 256 }
  0x1d   :  { %p77_p13 = scmp.ne.s32.totalorder %s127_s1, %s76_s0  ;;  %p80_p0 = scmp.lt.u32.totalorder %s76_s0, %s127_s1 }
  0x1f   :  { %p82_p1 = pnand %p80_p0, %p77_p13 }
  0x21   :  { %85 = shalt.err (!%p82_p1)
}
  0x22   :  { %34 = dma.vmem_to_hbm [thread:$0]  %s32_s19, 256, %s127_s1, [#allocation4]  }
  0x23   :  { %88 = dma.done.wait [#allocation4], 256  }
  0x24   :  { %89 = vsyncadd [#allocation4], 4294967040 }
  0x25   :  { %38 = vsyncpa [#allocation3], 1 }
  0x26   :  { %39 = vsyncpa [#allocation4], 1 }

</bundles_post_ra>
